<compile_context>
chip_gen: v6e
topology: v6e:2x2x1
jax: 0.10.0
libtpu: 0.0.40
codegen_flags: <defaults>
</compile_context>

<pallas_src>
import functools

import jax
import jax.numpy as jnp
from jax.experimental import pallas as pl
from jax.experimental.pallas import tpu as pltpu

LN_EPS = 1e-5  # torch.nn.LayerNorm default


def _round_up(a: int, m: int) -> int:
    return -(-a // m) * m


def _layernorm_rows(x, gamma_f32, beta_f32, d_true: int):
    """LayerNorm over the last axis with f32 statistics and biased variance
    (matches torch.nn.LayerNorm).  If the feature dim was zero-padded, padded
    lanes of x / gamma / beta are zero, so the one-pass sums need no masking
    and padded lanes of the result are exactly zero."""
    inv_d = jnp.float32(1.0 / d_true)
    s1 = jnp.sum(x, axis=-1, keepdims=True, dtype=jnp.float32)
    xf = x.astype(jnp.float32)
    s2 = jnp.sum(xf * xf, axis=-1, keepdims=True)
    mean = s1 * inv_d
    var = jnp.maximum(s2 * inv_d - mean * mean, 0.0)
    inv = jax.lax.rsqrt(var + LN_EPS)
    return (xf - mean) * (inv * gamma_f32) + beta_f32


def _resident_kernel(x_ref, gamma_ref, beta_ref, w_ref, b_ref, o_ref, *, d_true):
    """Full-W-resident path: 1-D grid over row tiles; W fetched once."""
    y = _layernorm_rows(x_ref[...],
                        gamma_ref[...].astype(jnp.float32),
                        beta_ref[...].astype(jnp.float32),
                        d_true)
    out = jnp.dot(y.astype(w_ref.dtype), w_ref[...],
                  preferred_element_type=jnp.float32)
    out = out + b_ref[...].astype(jnp.float32)
    o_ref[...] = out.astype(o_ref.dtype)


def _ntiled_kernel(x_ref, gamma_ref, beta_ref, w_ref, b_ref, o_ref, y_ref, *, d_true):
    """N-tiled fallback: rows outer ("parallel"), output columns inner
    ("arbitrary").  LayerNorm runs only at j == 0 for each row tile; the
    normalized activations are cached in VMEM for the remaining column tiles."""
    @pl.when(pl.program_id(1) == 0)
    def _():
        y = _layernorm_rows(x_ref[...],
                            gamma_ref[...].astype(jnp.float32),
                            beta_ref[...].astype(jnp.float32),
                            d_true)
        y_ref[...] = y.astype(y_ref.dtype)

    out = jnp.dot(y_ref[...], w_ref[...], preferred_element_type=jnp.float32)
    out = out + b_ref[...].astype(jnp.float32)
    o_ref[...] = out.astype(o_ref.dtype)


def prenorm_linear(x, gamma, beta, w, b, *, tile_m=256, cast_to_bf16=False,
                   vmem_fraction=0.75):
    """fn(LayerNorm(x)) with fn = Linear(D, D).

    x: (B, S, D); gamma/beta/b: (D,); w: (D, D) stored as (in, out) so the
    kernel computes y @ W + b.
    """
    B, S, D = x.shape
    rows = B * S

    # Feature dim: pad to a multiple of 128 only when necessary.  For the
    # common transformer case (D % 128 == 0) there are no pad/slice copies.
    Dp = D if D % 128 == 0 else _round_up(D, 128)
    pad = Dp - D

    mm_dtype = jnp.bfloat16 if cast_to_bf16 else w.dtype
    x2 = x.reshape(rows, D)
    gamma2 = gamma.reshape(1, D)
    beta2 = beta.reshape(1, D)
    w2 = w.astype(mm_dtype)
    b2 = b.reshape(1, D)
    if pad:
        x2 = jnp.pad(x2, ((0, 0), (0, pad)))
        gamma2 = jnp.pad(gamma2, ((0, 0), (0, pad)))
        beta2 = jnp.pad(beta2, ((0, 0), (0, pad)))
        w2 = jnp.pad(w2, ((0, pad), (0, pad)))
        b2 = jnp.pad(b2, ((0, 0), (0, pad)))

    x_item = jnp.dtype(x.dtype).itemsize
    mm_item = jnp.dtype(mm_dtype).itemsize

    # Row tile: sublane-aligned, never larger than the row count; ragged last
    # row block (if rows % tile_m != 0) is masked by Pallas — no row padding.
    sub = max(8, 32 // x_item)
    tile_m = max(sub, _round_up(min(tile_m, rows), sub))
    grid_rows = pl.cdiv(rows, tile_m)

    # Per-core VMEM capacity: 128 MiB on v5e/v6e, 64 MiB on v7x.
    try:
        vmem_cap = int(pltpu.get_tpu_info().vmem_capacity_bytes)
    except Exception:
        vmem_cap = 64 * 1024 * 1024  # conservative default (v7x per-core)
    vmem_budget = int(vmem_cap * vmem_fraction)
    vmem_limit = min(int(vmem_cap * 0.9), 127 * 1024 * 1024)

    w_bytes = Dp * Dp * mm_item
    x_tile_bytes = tile_m * Dp * x_item
    out_tile_bytes = tile_m * Dp * x_item
    param_bytes = 4 * Dp * max(mm_item, 4)
    ln_temp_bytes = 3 * tile_m * Dp * 4  # transient f32 temporaries in the kernel

    # Resident plan: single-buffered W + double-buffered x / out tiles + temps.
    need_resident = (w_bytes + 2 * x_tile_bytes + 2 * out_tile_bytes
                     + 2 * param_bytes + ln_temp_bytes)

    def _const_spec(shape, index_map, single_buffered):
        if single_buffered:
            # Constant block index => fetched once; a single buffer avoids
            # duplicating the resident slab in VMEM (critical on v7x's 64 MiB).
            return pl.BlockSpec(shape, index_map, pipeline_mode=pl.Buffered(1))
        return pl.BlockSpec(shape, index_map)

    if need_resident <= vmem_budget:
        # ---------------- Path A: full-W residency, 1-D grid over row tiles.
        flops = 2 * rows * Dp * Dp
        bytes_accessed = int(rows * Dp * x_item      # x read once
                             + w_bytes               # W read once (resident)
                             + rows * Dp * x_item    # output written once
                             + 3 * Dp * 4)
        cost = pl.CostEstimate(flops=flops, transcendentals=rows,
                               bytes_accessed=bytes_accessed)
        kernel = functools.partial(_resident_kernel, d_true=D)

        def run(single_buffered):
            return pl.pallas_call(
                kernel,
                out_shape=jax.ShapeDtypeStruct((rows, Dp), x.dtype),
                grid_spec=pltpu.PrefetchScalarGridSpec(
                    num_scalar_prefetch=0,
                    grid=(grid_rows,),
                    in_specs=[
                        pl.BlockSpec((tile_m, Dp), lambda i: (i, 0)),             # x
                        _const_spec((1, Dp), lambda i: (0, 0), single_buffered),  # gamma
                        _const_spec((1, Dp), lambda i: (0, 0), single_buffered),  # beta
                        _const_spec((Dp, Dp), lambda i: (0, 0), single_buffered),  # W
                        _const_spec((1, Dp), lambda i: (0, 0), single_buffered),  # bias
                    ],
                    out_specs=pl.BlockSpec((tile_m, Dp), lambda i: (i, 0)),
                ),
                compiler_params=pltpu.CompilerParams(
                    dimension_semantics=("parallel",),
                    vmem_limit_bytes=vmem_limit),
                cost_estimate=cost,
            )(x2, gamma2, beta2, w2, b2)

        try:
            out2 = run(True)
        except Exception:
            # pl.Buffered(1) not supported by this jax/libtpu -> default buffering.
            out2 = run(False)
    else:
        # ---------------- Path B: W too large for VMEM residency -> column tiling.
        # tile_n is a multiple of 256 so the 256-wide MXUs on v6e/v7x stay full;
        # cdiv grid allows a ragged last column block.
        fixed = (2 * x_tile_bytes + tile_m * Dp * mm_item   # x buffers + y cache
                 + ln_temp_bytes + 2 * param_bytes)
        col_budget = max(vmem_budget - fixed, 2 * Dp * 256 * mm_item)
        per_col = 2 * Dp * mm_item + 2 * tile_m * x_item    # W + out double buffers
        cols = max(int(col_budget // per_col), 128)
        tile_n = (cols // 256) * 256 if cols >= 256 else 128
        tile_n = min(tile_n, Dp)
        grid_n = pl.cdiv(Dp, tile_n)

        flops = 2 * rows * Dp * Dp
        bytes_accessed = int(rows * Dp * x_item             # x read once per row tile
                             + grid_rows * w_bytes          # W re-streamed per row tile
                             + rows * Dp * x_item
                             + 3 * Dp * 4)
        cost = pl.CostEstimate(flops=flops, transcendentals=rows,
                               bytes_accessed=bytes_accessed)
        kernel = functools.partial(_ntiled_kernel, d_true=D)

        def run(single_buffered):
            return pl.pallas_call(
                kernel,
                out_shape=jax.ShapeDtypeStruct((rows, Dp), x.dtype),
                grid_spec=pltpu.PrefetchScalarGridSpec(
                    num_scalar_prefetch=0,
                    grid=(grid_rows, grid_n),
                    in_specs=[
                        # x: constant over j -> DMA elided across the inner sweep.
                        pl.BlockSpec((tile_m, Dp), lambda i, j: (i, 0)),
                        _const_spec((1, Dp), lambda i, j: (0, 0), single_buffered),
                        _const_spec((1, Dp), lambda i, j: (0, 0), single_buffered),
                        pl.BlockSpec((Dp, tile_n), lambda i, j: (0, j)),   # W column block
                        pl.BlockSpec((1, tile_n), lambda i, j: (0, j)),    # bias block
                    ],
                    out_specs=pl.BlockSpec((tile_m, tile_n), lambda i, j: (i, j)),
                    scratch_shapes=[pltpu.VMEM((tile_m, Dp), mm_dtype)],   # cached LN(x)
                ),
                compiler_params=pltpu.CompilerParams(
                    dimension_semantics=("parallel", "arbitrary"),
                    vmem_limit_bytes=vmem_limit),
                cost_estimate=cost,
            )(x2, gamma2, beta2, w2, b2)

        try:
            out2 = run(True)
        except Exception:
            out2 = run(False)

    if pad:
        out2 = out2[:, :D]
    return out2.reshape(B, S, D)


def _reference(x, gamma, beta, w, b):
    xf = x.astype(jnp.float32)
    mean = jnp.mean(xf, axis=-1, keepdims=True)
    var = jnp.mean((xf - mean) ** 2, axis=-1, keepdims=True)
    y = (xf - mean) / jnp.sqrt(var + LN_EPS) * gamma + beta
    return (y @ w + b).astype(x.dtype)


if __name__ == "__main__":
    B, S, D = 2, 8, 32
    key = jax.random.PRNGKey(0)
    kx, kw, kb, kg, kbe = jax.random.split(key, 5)

    x = jax.random.normal(kx, (B, S, D), dtype=jnp.float32)

    # LayerNorm affine params (non-trivial so they are actually exercised).
    gamma = 1.0 + 0.1 * jax.random.normal(kg, (D,), dtype=jnp.float32)
    beta = 0.05 * jax.random.normal(kbe, (D,), dtype=jnp.float32)
    # fn = Linear(D, D); stored as (in, out) so the kernel computes y @ W + b.
    w = jax.random.normal(kw, (D, D), dtype=jnp.float32) * (1.0 / jnp.sqrt(D))
    b = jax.random.normal(kb, (D,), dtype=jnp.float32) * 0.01

    out = prenorm_linear(x, gamma, beta, w, b)
    out = jax.block_until_ready(out)

    ref = _reference(x, gamma, beta, w, b)
    assert out.shape == (B, S, D)
    assert jnp.allclose(out, ref, atol=1e-4, rtol=1e-4), float(
        jnp.max(jnp.abs(out - ref)))

    print("KERNEL_OK")
</pallas_src>

<mosaic_0001>
module attributes {stable_mosaic.version = 11 : i64} {
  func.func @_resident_kernel(%arg0: i32, %arg1: memref<16x128xf32, #tpu.memory_space<vmem>>, %arg2: memref<1x128xf32, #tpu.memory_space<vmem>>, %arg3: memref<1x128xf32, #tpu.memory_space<vmem>>, %arg4: memref<128x128xf32, #tpu.memory_space<vmem>>, %arg5: memref<1x128xf32, #tpu.memory_space<vmem>>, %arg6: memref<16x128xf32, #tpu.memory_space<vmem>>) attributes {dimension_semantics = [#tpu.dimension_semantics<parallel>], iteration_bounds = array<i64: 1>, scalar_prefetch = 0 : i64, scratch_operands = 0 : i64, tpu.core_type = #tpu.core_type<tc>, window_params = [{transform_indices = @transform_0, window_bounds = array<i64: 16, 128>}, {pipeline_mode = #tpu.pipeline_mode<synchronous>, transform_indices = @transform_1, window_bounds = array<i64: 1, 128>}, {pipeline_mode = #tpu.pipeline_mode<synchronous>, transform_indices = @transform_2, window_bounds = array<i64: 1, 128>}, {pipeline_mode = #tpu.pipeline_mode<synchronous>, transform_indices = @transform_3, window_bounds = array<i64: 128, 128>}, {pipeline_mode = #tpu.pipeline_mode<synchronous>, transform_indices = @transform_4, window_bounds = array<i64: 1, 128>}, {transform_indices = @transform_5, window_bounds = array<i64: 16, 128>}]} {
    %c0 = arith.constant 0 : index
    %c0_0 = arith.constant 0 : index
    %0 = vector.load %arg1[%c0, %c0_0] : memref<16x128xf32, #tpu.memory_space<vmem>>, vector<16x128xf32>
    %c0_1 = arith.constant 0 : index
    %c0_2 = arith.constant 0 : index
    %1 = vector.load %arg2[%c0_1, %c0_2] : memref<1x128xf32, #tpu.memory_space<vmem>>, vector<1x128xf32>
    %c0_3 = arith.constant 0 : index
    %c0_4 = arith.constant 0 : index
    %2 = vector.load %arg3[%c0_3, %c0_4] : memref<1x128xf32, #tpu.memory_space<vmem>>, vector<1x128xf32>
    %cst = arith.constant dense<0.000000e+00> : vector<16xf32>
    %3 = vector.multi_reduction <add>, %0, %cst [1] : vector<16x128xf32> to vector<16xf32>
    %4 = vector.shape_cast %3 : vector<16xf32> to vector<16x1xf32>
    %5 = arith.mulf %0, %0 : vector<16x128xf32>
    %cst_5 = arith.constant dense<0.000000e+00> : vector<16xf32>
    %6 = vector.multi_reduction <add>, %5, %cst_5 [1] : vector<16x128xf32> to vector<16xf32>
    %7 = vector.shape_cast %6 : vector<16xf32> to vector<16x1xf32>
    %cst_6 = arith.constant 3.125000e-02 : f32
    %8 = vector.broadcast %cst_6 : f32 to vector<16x1xf32>
    %9 = arith.mulf %4, %8 : vector<16x1xf32>
    %cst_7 = arith.constant 3.125000e-02 : f32
    %10 = vector.broadcast %cst_7 : f32 to vector<16x1xf32>
    %11 = arith.mulf %7, %10 : vector<16x1xf32>
    %12 = arith.mulf %9, %9 : vector<16x1xf32>
    %13 = arith.subf %11, %12 : vector<16x1xf32>
    %cst_8 = arith.constant 0.000000e+00 : f32
    %14 = vector.broadcast %cst_8 : f32 to vector<16x1xf32>
    %15 = arith.maximumf %13, %14 : vector<16x1xf32>
    %cst_9 = arith.constant 9.99999974E-6 : f32
    %16 = vector.broadcast %cst_9 : f32 to vector<16x1xf32>
    %17 = arith.addf %15, %16 : vector<16x1xf32>
    %18 = math.rsqrt %17 : vector<16x1xf32>
    %19 = vector.broadcast %9 : vector<16x1xf32> to vector<16x128xf32>
    %20 = arith.subf %0, %19 : vector<16x128xf32>
    %21 = vector.broadcast %18 : vector<16x1xf32> to vector<16x128xf32>
    %22 = vector.broadcast %1 : vector<1x128xf32> to vector<16x128xf32>
    %23 = arith.mulf %21, %22 : vector<16x128xf32>
    %24 = arith.mulf %20, %23 : vector<16x128xf32>
    %25 = vector.broadcast %2 : vector<1x128xf32> to vector<16x128xf32>
    %26 = arith.addf %24, %25 : vector<16x128xf32>
    %c0_10 = arith.constant 0 : index
    %c0_11 = arith.constant 0 : index
    %27 = vector.load %arg4[%c0_10, %c0_11] : memref<128x128xf32, #tpu.memory_space<vmem>>, vector<128x128xf32>
    %cst_12 = arith.constant dense<0.000000e+00> : vector<16x128xf32>
    %28 = tpu.matmul %26, %27, %cst_12 {dimension_numbers = #tpu.dot_dimension_numbers<[1], [0], [0], [1], [0, 0, 1, 1], [], []>} : vector<16x128xf32>, vector<128x128xf32>, vector<16x128xf32> -> vector<16x128xf32>
    %c0_13 = arith.constant 0 : index
    %c0_14 = arith.constant 0 : index
    %29 = vector.load %arg5[%c0_13, %c0_14] : memref<1x128xf32, #tpu.memory_space<vmem>>, vector<1x128xf32>
    %30 = vector.broadcast %29 : vector<1x128xf32> to vector<16x128xf32>
    %31 = arith.addf %28, %30 : vector<16x128xf32>
    %c0_15 = arith.constant 0 : index
    %c0_16 = arith.constant 0 : index
    %32 = vector.load %arg6[%c0_15, %c0_16] : memref<16x128xf32, #tpu.memory_space<vmem>>, vector<16x128xf32>
    tpu.vector_store %arg6[%c0_15, %c0_16], %31 {strides = array<i32>} : memref<16x128xf32, #tpu.memory_space<vmem>>, vector<16x128xf32>,
    return
  }
  func.func @transform_0(%arg0: i32) -> (i32, i32) {
    %c0_i32 = arith.constant 0 : i32
    %c0_i32_0 = arith.constant 0 : i32
    return %arg0, %c0_i32 : i32, i32
  }
  func.func @transform_1(%arg0: i32) -> (i32, i32) {
    %c0_i32 = arith.constant 0 : i32
    %c0_i32_0 = arith.constant 0 : i32
    %c0_i32_1 = arith.constant 0 : i32
    return %c0_i32, %c0_i32_0 : i32, i32
  }
  func.func @transform_2(%arg0: i32) -> (i32, i32) {
    %c0_i32 = arith.constant 0 : i32
    %c0_i32_0 = arith.constant 0 : i32
    %c0_i32_1 = arith.constant 0 : i32
    return %c0_i32, %c0_i32_0 : i32, i32
  }
  func.func @transform_3(%arg0: i32) -> (i32, i32) {
    %c0_i32 = arith.constant 0 : i32
    %c0_i32_0 = arith.constant 0 : i32
    %c0_i32_1 = arith.constant 0 : i32
    return %c0_i32, %c0_i32_0 : i32, i32
  }
  func.func @transform_4(%arg0: i32) -> (i32, i32) {
    %c0_i32 = arith.constant 0 : i32
    %c0_i32_0 = arith.constant 0 : i32
    %c0_i32_1 = arith.constant 0 : i32
    return %c0_i32, %c0_i32_0 : i32, i32
  }
  func.func @transform_5(%arg0: i32) -> (i32, i32) {
    %c0_i32 = arith.constant 0 : i32
    %c0_i32_0 = arith.constant 0 : i32
    return %arg0, %c0_i32 : i32, i32
  }
}

module attributes {stable_mosaic.version = 11 : i64} {
  func.func @_resident_kernel(%arg0: i32, %arg1: memref<16x128xf32, #tpu.memory_space<vmem>>, %arg2: memref<1x128xf32, #tpu.memory_space<vmem>>, %arg3: memref<1x128xf32, #tpu.memory_space<vmem>>, %arg4: memref<128x128xf32, #tpu.memory_space<vmem>>, %arg5: memref<1x128xf32, #tpu.memory_space<vmem>>, %arg6: memref<16x128xf32, #tpu.memory_space<vmem>>) attributes {dimension_semantics = [#tpu.dimension_semantics<parallel>], iteration_bounds = array<i64: 1>, scalar_prefetch = 0 : i64, scratch_operands = 0 : i64, tpu.core_type = #tpu.core_type<tc>, window_params = [{transform_indices = @transform_0, window_bounds = array<i64: 16, 128>}, {pipeline_mode = #tpu.pipeline_mode<synchronous>, transform_indices = @transform_1, window_bounds = array<i64: 1, 128>}, {pipeline_mode = #tpu.pipeline_mode<synchronous>, transform_indices = @transform_2, window_bounds = array<i64: 1, 128>}, {pipeline_mode = #tpu.pipeline_mode<synchronous>, transform_indices = @transform_3, window_bounds = array<i64: 128, 128>}, {pipeline_mode = #tpu.pipeline_mode<synchronous>, transform_indices = @transform_4, window_bounds = array<i64: 1, 128>}, {transform_indices = @transform_5, window_bounds = array<i64: 16, 128>}]} {
    %c0 = arith.constant 0 : index
    %c0_0 = arith.constant 0 : index
    %0 = vector.load %arg1[%c0, %c0_0] : memref<16x128xf32, #tpu.memory_space<vmem>>, vector<16x128xf32>
    %c0_1 = arith.constant 0 : index
    %c0_2 = arith.constant 0 : index
    %1 = vector.load %arg2[%c0_1, %c0_2] : memref<1x128xf32, #tpu.memory_space<vmem>>, vector<1x128xf32>
    %c0_3 = arith.constant 0 : index
    %c0_4 = arith.constant 0 : index
    %2 = vector.load %arg3[%c0_3, %c0_4] : memref<1x128xf32, #tpu.memory_space<vmem>>, vector<1x128xf32>
    %cst = arith.constant dense<0.000000e+00> : vector<16xf32>
    %3 = vector.multi_reduction <add>, %0, %cst [1] : vector<16x128xf32> to vector<16xf32>
    %4 = vector.shape_cast %3 : vector<16xf32> to vector<16x1xf32>
    %5 = arith.mulf %0, %0 : vector<16x128xf32>
    %cst_5 = arith.constant dense<0.000000e+00> : vector<16xf32>
    %6 = vector.multi_reduction <add>, %5, %cst_5 [1] : vector<16x128xf32> to vector<16xf32>
    %7 = vector.shape_cast %6 : vector<16xf32> to vector<16x1xf32>
    %cst_6 = arith.constant 3.125000e-02 : f32
    %8 = vector.broadcast %cst_6 : f32 to vector<16x1xf32>
    %9 = arith.mulf %4, %8 : vector<16x1xf32>
    %cst_7 = arith.constant 3.125000e-02 : f32
    %10 = vector.broadcast %cst_7 : f32 to vector<16x1xf32>
    %11 = arith.mulf %7, %10 : vector<16x1xf32>
    %12 = arith.mulf %9, %9 : vector<16x1xf32>
    %13 = arith.subf %11, %12 : vector<16x1xf32>
    %cst_8 = arith.constant 0.000000e+00 : f32
    %14 = vector.broadcast %cst_8 : f32 to vector<16x1xf32>
    %15 = arith.maximumf %13, %14 : vector<16x1xf32>
    %cst_9 = arith.constant 9.99999974E-6 : f32
    %16 = vector.broadcast %cst_9 : f32 to vector<16x1xf32>
    %17 = arith.addf %15, %16 : vector<16x1xf32>
    %18 = math.rsqrt %17 : vector<16x1xf32>
    %19 = vector.broadcast %9 : vector<16x1xf32> to vector<16x128xf32>
    %20 = arith.subf %0, %19 : vector<16x128xf32>
    %21 = vector.broadcast %18 : vector<16x1xf32> to vector<16x128xf32>
    %22 = vector.broadcast %1 : vector<1x128xf32> to vector<16x128xf32>
    %23 = arith.mulf %21, %22 : vector<16x128xf32>
    %24 = arith.mulf %20, %23 : vector<16x128xf32>
    %25 = vector.broadcast %2 : vector<1x128xf32> to vector<16x128xf32>
    %26 = arith.addf %24, %25 : vector<16x128xf32>
    %c0_10 = arith.constant 0 : index
    %c0_11 = arith.constant 0 : index
    %27 = vector.load %arg4[%c0_10, %c0_11] : memref<128x128xf32, #tpu.memory_space<vmem>>, vector<128x128xf32>
    %cst_12 = arith.constant dense<0.000000e+00> : vector<16x128xf32>
    %28 = tpu.matmul %26, %27, %cst_12 {dimension_numbers = #tpu.dot_dimension_numbers<[1], [0], [0], [1], [0, 0, 1, 1], [], []>} : vector<16x128xf32>, vector<128x128xf32>, vector<16x128xf32> -> vector<16x128xf32>
    %c0_13 = arith.constant 0 : index
    %c0_14 = arith.constant 0 : index
    %29 = vector.load %arg5[%c0_13, %c0_14] : memref<1x128xf32, #tpu.memory_space<vmem>>, vector<1x128xf32>
    %30 = vector.broadcast %29 : vector<1x128xf32> to vector<16x128xf32>
    %31 = arith.addf %28, %30 : vector<16x128xf32>
    %c0_15 = arith.constant 0 : index
    %c0_16 = arith.constant 0 : index
    %32 = vector.load %arg6[%c0_15, %c0_16] : memref<16x128xf32, #tpu.memory_space<vmem>>, vector<16x128xf32>
    tpu.vector_store %arg6[%c0_15, %c0_16], %31 {strides = array<i32>} : memref<16x128xf32, #tpu.memory_space<vmem>>, vector<16x128xf32>,
    return
  }
  func.func @transform_0(%arg0: i32) -> (i32, i32) {
    %c0_i32 = arith.constant 0 : i32
    %c0_i32_0 = arith.constant 0 : i32
    return %arg0, %c0_i32 : i32, i32
  }
  func.func @transform_1(%arg0: i32) -> (i32, i32) {
    %c0_i32 = arith.constant 0 : i32
    %c0_i32_0 = arith.constant 0 : i32
    %c0_i32_1 = arith.constant 0 : i32
    return %c0_i32, %c0_i32_0 : i32, i32
  }
  func.func @transform_2(%arg0: i32) -> (i32, i32) {
    %c0_i32 = arith.constant 0 : i32
    %c0_i32_0 = arith.constant 0 : i32
    %c0_i32_1 = arith.constant 0 : i32
    return %c0_i32, %c0_i32_0 : i32, i32
  }
  func.func @transform_3(%arg0: i32) -> (i32, i32) {
    %c0_i32 = arith.constant 0 : i32
    %c0_i32_0 = arith.constant 0 : i32
    %c0_i32_1 = arith.constant 0 : i32
    return %c0_i32, %c0_i32_0 : i32, i32
  }
  func.func @transform_4(%arg0: i32) -> (i32, i32) {
    %c0_i32 = arith.constant 0 : i32
    %c0_i32_0 = arith.constant 0 : i32
    %c0_i32_1 = arith.constant 0 : i32
    return %c0_i32, %c0_i32_0 : i32, i32
  }
  func.func @transform_5(%arg0: i32) -> (i32, i32) {
    %c0_i32 = arith.constant 0 : i32
    %c0_i32_0 = arith.constant 0 : i32
    return %arg0, %c0_i32 : i32, i32
  }
}

</mosaic_0001>

<bundles_post_ra>
// kernel: tpu_custom_call.1
= control target key start
LH: loop header
LB: loop body
LE: loop exit
PB: predicated region body
PF: predicated region fallthrough
CT: control target
= control target key end

     0   :  { %10 = vsyncpa [#allocation3], 0  ;;  %s420_s0 = inlined_call_operand.hbm [shape: f32[16,128], index: 0, kind: input, shape index: {}]   ;;  %s421_s1 = inlined_call_operand.vmem [shape: f32[1,128], index: 1, kind: input, shape index: {}]   ;;  %s422_s2 = inlined_call_operand.vmem [shape: f32[1,128], index: 2, kind: input, shape index: {}]   ;;  %s423_s3 = inlined_call_operand.hbm [shape: f32[128,128], index: 3, kind: input, shape index: {}]   ;;  %s424_s4 = inlined_call_operand.vmem [shape: f32[1,128], index: 4, kind: input, shape index: {}]   ;;  %s425_s5 = inlined_call_operand.hbm [shape: f32[16,128], index: 5, kind: output, shape index: {}]  }
   0x1   :  { %11 = vsyncpa [#allocation6], 0 }
   0x2   :  { %12 = vsyncpa [#allocation4], 0  ;;  %s346_s18 = smov [#allocation2]  }
   0x3   :  { %s18_s19 = sshll.u32 %s346_s18, 4  ;;  %s19_s19 = int_to_ptr.vmem [resolvable:$true] %s18_s19 }
   0x4   :  { %s288_s20 = scalar_lea.vmem %s19_s19, 256  ;;  %p293_p1 = scmp.lt.s32.totalorder %s19_s19, %s19_s19 }
   0x5   :  { %p289_p0 = scmp.ne.s32.totalorder %s19_s19, %s288_s20  ;;  %p294_p2 = scmp.lt.s32.totalorder %s288_s20, %s288_s20 }
   0x7   :  { %p295_p3 = por %p294_p2, %p293_p1 }
   0x9   :  { %p296_p4 = pnand %p295_p3, %p289_p0 }
   0xb   :  { %299 = shalt.err (!%p296_p4)
}
   0xc   :  { %s347_s21 = smov 128   ;;  %s348_s22 = smov 8  }
   0xd   :  { %24 = dma.hbm_to_vmem [thread:$0]  %s420_s0, 256, %s19_s19, [#allocation3], %s347_s21, %s347_s21, %s348_s22  }
   0xe   :  { %s349_s25 = smov [#allocation5]  }
   0xf   :  { %s34_s26 = sshll.u32 %s349_s25, 4  ;;  %s35_s26 = int_to_ptr.vmem [resolvable:$true] %s34_s26 }
  0x10   :  { %s308_s27 = scalar_lea.vmem %s35_s26, 2048  ;;  %p313_p6 = scmp.lt.s32.totalorder %s35_s26, %s35_s26 }
  0x11   :  { %p309_p5 = scmp.ne.s32.totalorder %s35_s26, %s308_s27  ;;  %p314_p7 = scmp.lt.s32.totalorder %s308_s27, %s308_s27 }
  0x13   :  { %p315_p8 = por %p314_p7, %p313_p6 }
  0x15   :  { %p316_p9 = pnand %p315_p8, %p309_p5 }
  0x17   :  { %319 = shalt.err (!%p316_p9)
}
  0x18   :  { %40 = dma.hbm_to_vmem [thread:$0]  %s423_s3, 2048, %s35_s26, [#allocation6], %s347_s21, %s347_s21, %s348_s22  }
  0x19   :  { %340 = dma.done.wait [#allocation3], 256  }
  0x1a   :  { %341 = vsyncadd [#allocation3], 4294967040 }
  0x1b   :  { %342 = dma.done.wait [#allocation6], 2048  }
  0x1c   :  { %343 = vsyncadd [#allocation6], 4294965248  ;;  %v393_v0 = vld [vmem:[#allocation2] sm:$0xff]  ;;  %v395_v1 = vld [vmem:[#allocation2 + $0x8] sm:$0xff]  ;;  %s350_s8 = smov [#allocation7]  }
  0x1d   :  { %53 = vadd.xlane.f32.xlu0 %v393_v0  ;;  %v57_v2 = vmul.f32 %v393_v0, %v393_v0  ;;  %v58_v3 = vmul.f32 %v395_v1, %v395_v1  ;;  %v112_v4 = vld [vmem:[#allocation5 + $0x78] sm:$0xff]  ;;  %v111_v5 = vld [vmem:[#allocation5 + $0x70] sm:$0xff]  ;;  %v110_v6 = vld [vmem:[#allocation5 + $0x68] sm:$0xff]  ;;  %s202_s9 = sshll.u32 %s350_s8, 4  ;;  %s203_s9 = int_to_ptr.vmem [resolvable:$true] %s202_s9 }
  0x1e   :  { %236 = vmatprep.subr.mxu0 %v112_v4  ;;  %v109_v7 = vld [vmem:[#allocation5 + $0x60] sm:$0xff]  ;;  %v108_v8 = vld [vmem:[#allocation5 + $0x58] sm:$0xff]  ;;  %v107_v9 = vld [vmem:[#allocation5 + $0x50] sm:$0xff]  ;;  %p325_p11 = scmp.lt.s32.totalorder %s203_s9, %s203_s9 }
  0x1f   :  { %59 = vadd.xlane.f32.xlu1 %v57_v2  ;;  %237 = vmatpush3.msra.mxu0 %v112_v4  ;;  %v106_v10 = vld [vmem:[#allocation5 + $0x48] sm:$0xff]  ;;  %v105_v11 = vld [vmem:[#allocation5 + $0x40] sm:$0xff]  ;;  %v104_v12 = vld [vmem:[#allocation5 + $0x38] sm:$0xff] }
  0x20   :  { %238 = vmatprep.subr.mxu0 %v111_v5  ;;  %v103_v13 = vld [vmem:[#allocation5 + $0x30] sm:$0xff]  ;;  %v102_v14 = vld [vmem:[#allocation5 + $0x28] sm:$0xff]  ;;  %v101_v15 = vld [vmem:[#allocation5 + $0x20] sm:$0xff] }
  0x21   :  { %55 = vadd.xlane.f32.xlu0 %v395_v1  ;;  %239 = vmatpush3.msra.mxu0 %v111_v5  ;;  %v100_v16 = vld [vmem:[#allocation5 + $0x18] sm:$0xff]  ;;  %v99_v17 = vld [vmem:[#allocation5 + $0x10] sm:$0xff]  ;;  %v98_v18 = vld [vmem:[#allocation5 + $0x8] sm:$0xff] }
  0x22   :  { %240 = vmatprep.subr.mxu0 %v110_v6  ;;  %v97_v19 = vld [vmem:[#allocation5] sm:$0xff]  ;;  %v215_v36 = vld [vmem:[%s421_s1] ss:$0 sm:$0xff] }
  0x23   :  { %61 = vadd.xlane.f32.xlu1 %v58_v3  ;;  %241 = vmatpush3.msra.mxu0 %v110_v6  ;;  %v216_v40 = vld [vmem:[%s422_s2] ss:$0 sm:$0xff]  ;;  %s320_s2 = scalar_lea.vmem %s203_s9, 256 }
  0x24   :  { %242 = vmatprep.subr.mxu0 %v109_v7  ;;  %v217_v48 = vld [vmem:[%s424_s4] ss:$0 sm:$0xff]  ;;  %p321_p10 = scmp.ne.s32.totalorder %s203_s9, %s320_s2  ;;  %p326_p12 = scmp.lt.s32.totalorder %s320_s2, %s320_s2 }
  0x25   :  { %243 = vmatpush3.msra.mxu0 %v109_v7 }
  0x26   :  { %244 = vmatprep.subr.mxu0 %v108_v8  ;;  %p327_p13 = por %p326_p12, %p325_p11 }
  0x27   :  { %245 = vmatpush3.msra.mxu0 %v108_v8 }
  0x28   :  { %246 = vmatprep.subr.mxu0 %v107_v9  ;;  %p328_p0 = pnand %p327_p13, %p321_p10 }
  0x29   :  { %247 = vmatpush3.msra.mxu0 %v107_v9 }
  0x2a   :  { %248 = vmatprep.subr.mxu0 %v106_v10 }
  0x2b   :  { %249 = vmatpush3.msra.mxu0 %v106_v10 }
  0x2c   :  { %250 = vmatprep.subr.mxu0 %v105_v11 }
  0x2d   :  { %251 = vmatpush3.msra.mxu0 %v105_v11 }
  0x2e   :  { %252 = vmatprep.subr.mxu0 %v104_v12 }
  0x2f   :  { %253 = vmatpush3.msra.mxu0 %v104_v12 }
  0x30   :  { %254 = vmatprep.subr.mxu0 %v103_v13 }
  0x31   :  { %255 = vmatpush3.msra.mxu0 %v103_v13 }
  0x32   :  { %256 = vmatprep.subr.mxu0 %v102_v14 }
  0x33   :  { %257 = vmatpush3.msra.mxu0 %v102_v14 }
  0x34   :  { %258 = vmatprep.subr.mxu0 %v101_v15 }
  0x35   :  { %259 = vmatpush3.msra.mxu0 %v101_v15 }
  0x36   :  { %260 = vmatprep.subr.mxu0 %v100_v16 }
  0x37   :  { %261 = vmatpush3.msra.mxu0 %v100_v16 }
  0x38   :  { %262 = vmatprep.subr.mxu0 %v99_v17 }
  0x39   :  { %263 = vmatpush3.msra.mxu0 %v99_v17 }
  0x3a   :  { %264 = vmatprep.subr.mxu0 %v98_v18 }
  0x3b   :  { %265 = vmatpush3.msra.mxu0 %v98_v18 }
  0x3c   :  { %266 = vmatprep.subr.mxu0 %v97_v19 }
  0x3d   :  { %267 = vmatpush3.msra.mxu0 %v97_v19 }
  0xa6   :  { %v54_v20 = vpop.xlane.xlu0 %53 }
  0xa7   :  { %v63_v21 = vmul.f32 0.03125, %v54_v20 }
  0xa8   :  { %v60_v22 = vpop.xlane.xlu1 %59 }
  0xa9   :  { %v67_v23 = vmul.f32 %v63_v21, %v63_v21  ;;  %v65_v24 = vmul.f32 0.03125, %v60_v22  ;;  %v77_v38 = vsub.f32 %v393_v0, %v63_v21 }
  0xaa   :  { %v56_v25 = vpop.xlane.xlu0 %55 }
  0xab   :  { %v69_v26 = vsub.f32 %v65_v24, %v67_v23  ;;  %v64_v27 = vmul.f32 0.03125, %v56_v25 }
  0xac   :  { %v62_v28 = vpop.xlane.xlu1 %61 }
  0xad   :  { %v71_v29 = vmax.f32 %v69_v26, 0.0  ;;  %v68_v30 = vmul.f32 %v64_v27, %v64_v27  ;;  %v66_v31 = vmul.f32 0.03125, %v62_v28  ;;  %v78_v43 = vsub.f32 %v395_v1, %v64_v27 }
  0xaf   :  { %v73_v32 = vadd.f32 1e-05, %v71_v29  ;;  %v70_v33 = vsub.f32 %v66_v31, %v68_v30 }
  0xb1   :  { %276 = vrsqrt.f32 %v73_v32  ;;  %v72_v34 = vmax.f32 %v70_v33, 0.0 }
  0xb3   :  { %v74_v35 = vadd.f32 1e-05, %v72_v34 }
  0xb5   :  { %278 = vrsqrt.f32 %v74_v35 }
  0xbe   :  { %v277_v37 = vpop.eup %276 }
  0xbf   :  { %v85_v39 = vmul.f32 %v277_v37, %v215_v36 }
  0xc1   :  { %v87_v41 = vmul.f32 %v85_v39, %v77_v38 }
  0xc2   :  { %v279_v42 = vpop.eup %278 }
  0xc3   :  { %v86_v44 = vmul.f32 %v279_v42, %v215_v36  ;;  %v95_v45 = vadd.f32 %v216_v40, %v87_v41 }
  0xc5   :  { %v88_v46 = vmul.f32 %v86_v44, %v78_v43  ;;  %268 = vmatprep.mubr.f32.mxu0 %v95_v45 }
  0xc7   :  { %v96_v47 = vadd.f32 %v216_v40, %v88_v46 }
  0xc9   :  { %269 = vmatmul.mubr.f32.vlgmr.msra.gmra.mxu0 %v96_v47 }
 0x189   :  { %v270_v49 = vpop.f32.mrf.mxu0 }
 0x18a   :  { %v192_v50 = vadd.f32 %v270_v49, %v217_v48 }
 0x18b   :  { %v186_v51 = vpop.f32.mrf.mxu0 }
 0x18c   :  { %196 = vst [vmem:[#allocation7 + $0x8] sm:$0xff] %v192_v50  ;;  %v187_v52 = vadd.f32 %v217_v48, %v186_v51 }
 0x18e   :  { %195 = vst [vmem:[#allocation7] sm:$0xff] %v187_v52 }
 0x18f   :  { %331 = shalt.err (!%p328_p0)
}
 0x190   :  { %208 = dma.vmem_to_hbm [thread:$0]  %s203_s9, 256, %s425_s5, [#allocation4], %s347_s21, %s347_s21, %s348_s22  }
 0x191   :  { %344 = dma.done.wait [#allocation4], 256  }
 0x192   :  { %345 = vsyncadd [#allocation4], 4294967040 }
 0x193   :  { %212 = vsyncpa [#allocation3], 1 }
 0x194   :  { %213 = vsyncpa [#allocation6], 1 }
 0x195   :  { %214 = vsyncpa [#allocation4], 1 }

// kernel: tpu_custom_call.1
= control target key start
LH: loop header
LB: loop body
LE: loop exit
PB: predicated region body
PF: predicated region fallthrough
CT: control target
= control target key end

     0   :  { %10 = vsyncpa [#allocation3], 0  ;;  %s420_s0 = inlined_call_operand.hbm [shape: f32[16,128], index: 0, kind: input, shape index: {}]   ;;  %s421_s1 = inlined_call_operand.vmem [shape: f32[1,128], index: 1, kind: input, shape index: {}]   ;;  %s422_s2 = inlined_call_operand.vmem [shape: f32[1,128], index: 2, kind: input, shape index: {}]   ;;  %s423_s3 = inlined_call_operand.hbm [shape: f32[128,128], index: 3, kind: input, shape index: {}]   ;;  %s424_s4 = inlined_call_operand.vmem [shape: f32[1,128], index: 4, kind: input, shape index: {}]   ;;  %s425_s5 = inlined_call_operand.hbm [shape: f32[16,128], index: 5, kind: output, shape index: {}]  }
   0x1   :  { %11 = vsyncpa [#allocation6], 0 }
   0x2   :  { %12 = vsyncpa [#allocation4], 0  ;;  %s346_s18 = smov [#allocation2]  }
   0x3   :  { %s18_s19 = sshll.u32 %s346_s18, 4  ;;  %s19_s19 = int_to_ptr.vmem [resolvable:$true] %s18_s19 }
   0x4   :  { %s288_s20 = scalar_lea.vmem %s19_s19, 256  ;;  %p293_p1 = scmp.lt.s32.totalorder %s19_s19, %s19_s19 }
   0x5   :  { %p289_p0 = scmp.ne.s32.totalorder %s19_s19, %s288_s20  ;;  %p294_p2 = scmp.lt.s32.totalorder %s288_s20, %s288_s20 }
   0x7   :  { %p295_p3 = por %p294_p2, %p293_p1 }
   0x9   :  { %p296_p4 = pnand %p295_p3, %p289_p0 }
   0xb   :  { %299 = shalt.err (!%p296_p4)
}
   0xc   :  { %s347_s21 = smov 128   ;;  %s348_s22 = smov 8  }
   0xd   :  { %24 = dma.hbm_to_vmem [thread:$0]  %s420_s0, 256, %s19_s19, [#allocation3], %s347_s21, %s347_s21, %s348_s22  }
   0xe   :  { %s349_s25 = smov [#allocation5]  }
   0xf   :  { %s34_s26 = sshll.u32 %s349_s25, 4  ;;  %s35_s26 = int_to_ptr.vmem [resolvable:$true] %s34_s26 }
  0x10   :  { %s308_s27 = scalar_lea.vmem %s35_s26, 2048  ;;  %p313_p6 = scmp.lt.s32.totalorder %s35_s26, %s35_s26 }
  0x11   :  { %p309_p5 = scmp.ne.s32.totalorder %s35_s26, %s308_s27  ;;  %p314_p7 = scmp.lt.s32.totalorder %s308_s27, %s308_s27 }
  0x13   :  { %p315_p8 = por %p314_p7, %p313_p6 }
  0x15   :  { %p316_p9 = pnand %p315_p8, %p309_p5 }
  0x17   :  { %319 = shalt.err (!%p316_p9)
}
  0x18   :  { %40 = dma.hbm_to_vmem [thread:$0]  %s423_s3, 2048, %s35_s26, [#allocation6], %s347_s21, %s347_s21, %s348_s22  }
  0x19   :  { %340 = dma.done.wait [#allocation3], 256  }
  0x1a   :  { %341 = vsyncadd [#allocation3], 4294967040 }
  0x1b   :  { %342 = dma.done.wait [#allocation6], 2048  }
  0x1c   :  { %343 = vsyncadd [#allocation6], 4294965248  ;;  %v393_v0 = vld [vmem:[#allocation2] sm:$0xff]  ;;  %v395_v1 = vld [vmem:[#allocation2 + $0x8] sm:$0xff]  ;;  %s350_s8 = smov [#allocation7]  }
  0x1d   :  { %53 = vadd.xlane.f32.xlu0 %v393_v0  ;;  %v57_v2 = vmul.f32 %v393_v0, %v393_v0  ;;  %v58_v3 = vmul.f32 %v395_v1, %v395_v1  ;;  %v112_v4 = vld [vmem:[#allocation5 + $0x78] sm:$0xff]  ;;  %v111_v5 = vld [vmem:[#allocation5 + $0x70] sm:$0xff]  ;;  %v110_v6 = vld [vmem:[#allocation5 + $0x68] sm:$0xff]  ;;  %s202_s9 = sshll.u32 %s350_s8, 4  ;;  %s203_s9 = int_to_ptr.vmem [resolvable:$true] %s202_s9 }
  0x1e   :  { %236 = vmatprep.subr.mxu0 %v112_v4  ;;  %v109_v7 = vld [vmem:[#allocation5 + $0x60] sm:$0xff]  ;;  %v108_v8 = vld [vmem:[#allocation5 + $0x58] sm:$0xff]  ;;  %v107_v9 = vld [vmem:[#allocation5 + $0x50] sm:$0xff]  ;;  %p325_p11 = scmp.lt.s32.totalorder %s203_s9, %s203_s9 }
  0x1f   :  { %59 = vadd.xlane.f32.xlu1 %v57_v2  ;;  %237 = vmatpush3.msra.mxu0 %v112_v4  ;;  %v106_v10 = vld [vmem:[#allocation5 + $0x48] sm:$0xff]  ;;  %v105_v11 = vld [vmem:[#allocation5 + $0x40] sm:$0xff]  ;;  %v104_v12 = vld [vmem:[#allocation5 + $0x38] sm:$0xff] }
  0x20   :  { %238 = vmatprep.subr.mxu0 %v111_v5  ;;  %v103_v13 = vld [vmem:[#allocation5 + $0x30] sm:$0xff]  ;;  %v102_v14 = vld [vmem:[#allocation5 + $0x28] sm:$0xff]  ;;  %v101_v15 = vld [vmem:[#allocation5 + $0x20] sm:$0xff] }
  0x21   :  { %55 = vadd.xlane.f32.xlu0 %v395_v1  ;;  %239 = vmatpush3.msra.mxu0 %v111_v5  ;;  %v100_v16 = vld [vmem:[#allocation5 + $0x18] sm:$0xff]  ;;  %v99_v17 = vld [vmem:[#allocation5 + $0x10] sm:$0xff]  ;;  %v98_v18 = vld [vmem:[#allocation5 + $0x8] sm:$0xff] }
  0x22   :  { %240 = vmatprep.subr.mxu0 %v110_v6  ;;  %v97_v19 = vld [vmem:[#allocation5] sm:$0xff]  ;;  %v215_v36 = vld [vmem:[%s421_s1] ss:$0 sm:$0xff] }
  0x23   :  { %61 = vadd.xlane.f32.xlu1 %v58_v3  ;;  %241 = vmatpush3.msra.mxu0 %v110_v6  ;;  %v216_v40 = vld [vmem:[%s422_s2] ss:$0 sm:$0xff]  ;;  %s320_s2 = scalar_lea.vmem %s203_s9, 256 }
  0x24   :  { %242 = vmatprep.subr.mxu0 %v109_v7  ;;  %v217_v48 = vld [vmem:[%s424_s4] ss:$0 sm:$0xff]  ;;  %p321_p10 = scmp.ne.s32.totalorder %s203_s9, %s320_s2  ;;  %p326_p12 = scmp.lt.s32.totalorder %s320_s2, %s320_s2 }
  0x25   :  { %243 = vmatpush3.msra.mxu0 %v109_v7 }
  0x26   :  { %244 = vmatprep.subr.mxu0 %v108_v8  ;;  %p327_p13 = por %p326_p12, %p325_p11 }
  0x27   :  { %245 = vmatpush3.msra.mxu0 %v108_v8 }
  0x28   :  { %246 = vmatprep.subr.mxu0 %v107_v9  ;;  %p328_p0 = pnand %p327_p13, %p321_p10 }
  0x29   :  { %247 = vmatpush3.msra.mxu0 %v107_v9 }
  0x2a   :  { %248 = vmatprep.subr.mxu0 %v106_v10 }
  0x2b   :  { %249 = vmatpush3.msra.mxu0 %v106_v10 }
  0x2c   :  { %250 = vmatprep.subr.mxu0 %v105_v11 }
  0x2d   :  { %251 = vmatpush3.msra.mxu0 %v105_v11 }
  0x2e   :  { %252 = vmatprep.subr.mxu0 %v104_v12 }
  0x2f   :  { %253 = vmatpush3.msra.mxu0 %v104_v12 }
  0x30   :  { %254 = vmatprep.subr.mxu0 %v103_v13 }
  0x31   :  { %255 = vmatpush3.msra.mxu0 %v103_v13 }
  0x32   :  { %256 = vmatprep.subr.mxu0 %v102_v14 }
  0x33   :  { %257 = vmatpush3.msra.mxu0 %v102_v14 }
  0x34   :  { %258 = vmatprep.subr.mxu0 %v101_v15 }
  0x35   :  { %259 = vmatpush3.msra.mxu0 %v101_v15 }
  0x36   :  { %260 = vmatprep.subr.mxu0 %v100_v16 }
  0x37   :  { %261 = vmatpush3.msra.mxu0 %v100_v16 }
  0x38   :  { %262 = vmatprep.subr.mxu0 %v99_v17 }
  0x39   :  { %263 = vmatpush3.msra.mxu0 %v99_v17 }
  0x3a   :  { %264 = vmatprep.subr.mxu0 %v98_v18 }
  0x3b   :  { %265 = vmatpush3.msra.mxu0 %v98_v18 }
  0x3c   :  { %266 = vmatprep.subr.mxu0 %v97_v19 }
  0x3d   :  { %267 = vmatpush3.msra.mxu0 %v97_v19 }
  0xa6   :  { %v54_v20 = vpop.xlane.xlu0 %53 }
  0xa7   :  { %v63_v21 = vmul.f32 0.03125, %v54_v20 }
  0xa8   :  { %v60_v22 = vpop.xlane.xlu1 %59 }
  0xa9   :  { %v67_v23 = vmul.f32 %v63_v21, %v63_v21  ;;  %v65_v24 = vmul.f32 0.03125, %v60_v22  ;;  %v77_v38 = vsub.f32 %v393_v0, %v63_v21 }
  0xaa   :  { %v56_v25 = vpop.xlane.xlu0 %55 }
  0xab   :  { %v69_v26 = vsub.f32 %v65_v24, %v67_v23  ;;  %v64_v27 = vmul.f32 0.03125, %v56_v25 }
  0xac   :  { %v62_v28 = vpop.xlane.xlu1 %61 }
  0xad   :  { %v71_v29 = vmax.f32 %v69_v26, 0.0  ;;  %v68_v30 = vmul.f32 %v64_v27, %v64_v27  ;;  %v66_v31 = vmul.f32 0.03125, %v62_v28  ;;  %v78_v43 = vsub.f32 %v395_v1, %v64_v27 }
  0xaf   :  { %v73_v32 = vadd.f32 1e-05, %v71_v29  ;;  %v70_v33 = vsub.f32 %v66_v31, %v68_v30 }
  0xb1   :  { %276 = vrsqrt.f32 %v73_v32  ;;  %v72_v34 = vmax.f32 %v70_v33, 0.0 }
  0xb3   :  { %v74_v35 = vadd.f32 1e-05, %v72_v34 }
  0xb5   :  { %278 = vrsqrt.f32 %v74_v35 }
  0xbe   :  { %v277_v37 = vpop.eup %276 }
  0xbf   :  { %v85_v39 = vmul.f32 %v277_v37, %v215_v36 }
  0xc1   :  { %v87_v41 = vmul.f32 %v85_v39, %v77_v38 }
  0xc2   :  { %v279_v42 = vpop.eup %278 }
  0xc3   :  { %v86_v44 = vmul.f32 %v279_v42, %v215_v36  ;;  %v95_v45 = vadd.f32 %v216_v40, %v87_v41 }
  0xc5   :  { %v88_v46 = vmul.f32 %v86_v44, %v78_v43  ;;  %268 = vmatprep.mubr.f32.mxu0 %v95_v45 }
  0xc7   :  { %v96_v47 = vadd.f32 %v216_v40, %v88_v46 }
  0xc9   :  { %269 = vmatmul.mubr.f32.vlgmr.msra.gmra.mxu0 %v96_v47 }
 0x189   :  { %v270_v49 = vpop.f32.mrf.mxu0 }
 0x18a   :  { %v192_v50 = vadd.f32 %v270_v49, %v217_v48 }
 0x18b   :  { %v186_v51 = vpop.f32.mrf.mxu0 }
 0x18c   :  { %196 = vst [vmem:[#allocation7 + $0x8] sm:$0xff] %v192_v50  ;;  %v187_v52 = vadd.f32 %v217_v48, %v186_v51 }
 0x18e   :  { %195 = vst [vmem:[#allocation7] sm:$0xff] %v187_v52 }
 0x18f   :  { %331 = shalt.err (!%p328_p0)
}
 0x190   :  { %208 = dma.vmem_to_hbm [thread:$0]  %s203_s9, 256, %s425_s5, [#allocation4], %s347_s21, %s347_s21, %s348_s22  }
 0x191   :  { %344 = dma.done.wait [#allocation4], 256  }
 0x192   :  { %345 = vsyncadd [#allocation4], 4294967040 }
 0x193   :  { %212 = vsyncpa [#allocation3], 1 }
 0x194   :  { %213 = vsyncpa [#allocation6], 1 }
 0x195   :  { %214 = vsyncpa [#allocation4], 1 }

</bundles_post_ra>
